<compile_context>
chip_gen: v5e
topology: v5e:2x2
jax: 0.10.0
libtpu: 0.0.40
codegen_flags: <defaults>
</compile_context>

<pallas_src>
from functools import partial

import jax
import jax.numpy as jnp
import numpy as np
from jax.experimental import pallas as pl
from jax.experimental.pallas import tpu as pltpu

TEMPERATURE = 0.1
LAMBDA_CS_REG = 0.5


def _loss_kernel(emb_ref, ratios_ref, out_ref, *, batch, temperature,
                 lambda_cs_reg, use_bf16):
    B = batch
    inv_t = 1.0 / temperature

    # ---- L2-normalize all 4B rows in one pass (f32) --------------------------
    x = emb_ref[...].astype(jnp.float32)                        # (4B, D)
    x = x * jax.lax.rsqrt(jnp.sum(x * x, axis=1, keepdims=True))

    lhs = x[: 2 * B]                                            # [E; K]          (2B, D)
    rhs = x                                                     # [E; K; Et; Kt]  (4B, D)

    # ---- ONE stacked gram matmul on the MXU ----------------------------------
    # Contract dim 1 of both operands -> (2B, 4B); no transpose materialized.
    if use_bf16:
        lhs_mm = lhs.astype(jnp.bfloat16)
        rhs_mm = rhs.astype(jnp.bfloat16)
    else:
        lhs_mm, rhs_mm = lhs, rhs
    logits = jax.lax.dot_general(
        lhs_mm, rhs_mm,
        dimension_numbers=(((1,), (1,)), ((), ())),
        preferred_element_type=jnp.float32) * inv_t             # (2B, 4B) f32

    # ---- single exp pass + rowsum-minus-diag reductions ----------------------
    g = jnp.exp(logits)

    rows = jax.lax.broadcasted_iota(jnp.int32, (2 * B, 4 * B), 0)
    cols = jax.lax.broadcasted_iota(jnp.int32, (2 * B, 4 * B), 1)
    rm = jnp.where(rows >= B, rows - B, rows)          # rows mod B (no int div)
    same_sample = ((cols == rm) | (cols == rm + B)
                   | (cols == rm + 2 * B) | (cols == rm + 3 * B))
    is_self = cols == rows                # EE diag (eng rows) / KK diag (kor rows)

    row_sum = jnp.sum(g, axis=1, keepdims=True)                            # (2B, 1)
    sum4 = jnp.sum(jnp.where(same_sample, g, 0.0), axis=1, keepdims=True)  # (2B, 1)
    self_d = jnp.sum(jnp.where(is_self, g, 0.0), axis=1, keepdims=True)    # (2B, 1)

    num = sum4 - self_d      # exp(sim) summed over the 3 positives of each anchor
    den = row_sum - self_d   # positives + all cross-sample negatives
    contrastive = jnp.sum(jnp.log(den) - jnp.log(num)) / (2.0 * B)

    # ---- code-switch regularizer (all f32) -----------------------------------
    E = x[0 * B:1 * B]
    K = x[1 * B:2 * B]
    Et = x[2 * B:3 * B]
    Kt = x[3 * B:4 * B]
    r = ratios_ref[...].astype(jnp.float32)            # (B, 2) = [etok_r, ktoe_r]
    r_et = r[:, 0:1]
    r_kt = r[:, 1:2]
    etok_target = r_et * E + (1.0 - r_et) * K
    ktoe_target = r_kt * K + (1.0 - r_kt) * E
    etok_reg = jnp.sqrt(jnp.sum((Et - etok_target) ** 2, axis=1, keepdims=True))
    ktoe_reg = jnp.sqrt(jnp.sum((Kt - ktoe_target) ** 2, axis=1, keepdims=True))
    cs_reg = jnp.sum(etok_reg + ktoe_reg) / B

    total = contrastive + lambda_cs_reg * cs_reg
    out_ref[0] = contrastive
    out_ref[1] = cs_reg
    out_ref[2] = total


@partial(jax.jit, static_argnames=("temperature", "lambda_cs_reg", "use_bf16"))
def _loss_vector(english, korean, etok, ktoe, etok_ratio, ktoe_ratio,
                 temperature=TEMPERATURE, lambda_cs_reg=LAMBDA_CS_REG,
                 use_bf16=True):
    """Jittable core: returns the (3,) vector [contrastive, cs_reg, total]."""
    B, D = english.shape
    stacked = jnp.concatenate(
        [english, korean, etok, ktoe], axis=0).astype(jnp.float32)   # (4B, D)
    ratios = jnp.stack(
        [etok_ratio.reshape(B).astype(jnp.float32),
         ktoe_ratio.reshape(B).astype(jnp.float32)], axis=1)         # (B, 2)

    kernel = partial(_loss_kernel, batch=B, temperature=temperature,
                     lambda_cs_reg=lambda_cs_reg, use_bf16=use_bf16)
    cost = pl.CostEstimate(
        flops=2 * (2 * B) * (4 * B) * D,                 # stacked gram matmul
        transcendentals=(2 * B) * (4 * B) + 10 * B,      # exp + log/sqrt/rsqrt
        bytes_accessed=(4 * B * D + 2 * B + 3) * 4)
    vmem = pl.BlockSpec(memory_space=pltpu.MemorySpace.VMEM)
    return pl.pallas_call(
        kernel,
        out_shape=jax.ShapeDtypeStruct((3,), jnp.float32),
        in_specs=[vmem, vmem],
        out_specs=pl.BlockSpec(memory_space=pltpu.MemorySpace.SMEM),
        cost_estimate=cost,
    )(stacked, ratios)


def refined_code_switch_loss(embeddings_dict, cs_ratios,
                             temperature=TEMPERATURE,
                             lambda_cs_reg=LAMBDA_CS_REG,
                             use_bf16=True):
    """Mirrors RefinedCodeSwitchLoss.forward: returns (total_loss, components)."""
    etok_ratio, ktoe_ratio = cs_ratios
    out = _loss_vector(embeddings_dict["english"], embeddings_dict["korean"],
                       embeddings_dict["etok"], embeddings_dict["ktoe"],
                       etok_ratio, ktoe_ratio,
                       temperature=temperature, lambda_cs_reg=lambda_cs_reg,
                       use_bf16=use_bf16)
    host = np.asarray(out)                      # single device->host transfer
    components = {
        "contrastive_loss": float(host[0]),
        "cs_reg_loss": float(host[1]),
        "total_loss": float(host[2]),
    }
    return out[2], components


def _reference(embeddings_dict, cs_ratios, temperature=TEMPERATURE,
               lambda_cs_reg=LAMBDA_CS_REG):
    """Pure-JAX replica of the PyTorch per-sample loop for verification."""
    def norm(x):
        return x / jnp.linalg.norm(x, axis=1, keepdims=True)

    E = norm(embeddings_dict["english"])
    Et = norm(embeddings_dict["etok"])
    Kt = norm(embeddings_dict["ktoe"])
    K = norm(embeddings_dict["korean"])
    B = E.shape[0]
    r_et, r_kt = cs_ratios

    contrastive = 0.0
    for i in range(B):
        negs = []
        for j in range(B):
            if j != i:
                negs += [E[j], K[j], Et[j], Kt[j]]
        neg_stack = jnp.stack(negs, axis=0)

        eng_pos = jnp.stack([Et[i], Kt[i], K[i]], axis=0)
        num = jnp.sum(jnp.exp(eng_pos @ E[i] / temperature))
        den = num + jnp.sum(jnp.exp(neg_stack @ E[i] / temperature))
        contrastive += -jnp.log(num / den)

        kor_pos = jnp.stack([Et[i], Kt[i], E[i]], axis=0)
        num = jnp.sum(jnp.exp(kor_pos @ K[i] / temperature))
        den = num + jnp.sum(jnp.exp(neg_stack @ K[i] / temperature))
        contrastive += -jnp.log(num / den)

    cs_reg = 0.0
    for i in range(B):
        etok_target = r_et[i] * E[i] + (1 - r_et[i]) * K[i]
        ktoe_target = r_kt[i] * K[i] + (1 - r_kt[i]) * E[i]
        cs_reg += jnp.linalg.norm(Et[i] - etok_target)
        cs_reg += jnp.linalg.norm(Kt[i] - ktoe_target)

    contrastive = contrastive / (2 * B)
    cs_reg = cs_reg / B
    return contrastive + lambda_cs_reg * cs_reg


if __name__ == "__main__":
    B, D = 8, 128
    key = jax.random.PRNGKey(0)
    keys = jax.random.split(key, 6)
    embeddings = {
        "english": jax.random.normal(keys[0], (B, D), dtype=jnp.float32),
        "etok":    jax.random.normal(keys[1], (B, D), dtype=jnp.float32),
        "ktoe":    jax.random.normal(keys[2], (B, D), dtype=jnp.float32),
        "korean":  jax.random.normal(keys[3], (B, D), dtype=jnp.float32),
    }
    cs_ratios = (
        jax.random.uniform(keys[4], (B,), dtype=jnp.float32),
        jax.random.uniform(keys[5], (B,), dtype=jnp.float32),
    )

    ref_total = float(_reference(embeddings, cs_ratios))

    # Exact-semantics path (f32 MXU operands).
    total_f32, comps_f32 = refined_code_switch_loss(
        embeddings, cs_ratios, use_bf16=False)
    total_f32 = jax.block_until_ready(total_f32)
    assert abs(float(total_f32) - ref_total) < 1e-3, (float(total_f32), ref_total)
    assert abs(comps_f32["total_loss"] - float(total_f32)) < 1e-6

    # Default fast path: bf16 MXU operands, f32 accumulation + f32 VPU/EUP math.
    total_fast, comps_fast = refined_code_switch_loss(embeddings, cs_ratios)
    total_fast = jax.block_until_ready(total_fast)
    assert abs(float(total_fast) - ref_total) < 5e-2, (float(total_fast), ref_total)

    print("KERNEL_OK")
</pallas_src>

<mosaic_0001>
module attributes {stable_mosaic.version = 11 : i64} {
  func.func @_loss_kernel(%arg0: memref<32x128xf32, #tpu.memory_space<vmem>>, %arg1: memref<8x2xf32, #tpu.memory_space<vmem>>, %arg2: memref<3xf32, #tpu.memory_space<smem>>) attributes {dimension_semantics = [], scalar_prefetch = 0 : i64, scratch_operands = 0 : i64, tpu.core_type = #tpu.core_type<tc>} {
    %c0 = arith.constant 0 : index
    %c0_0 = arith.constant 0 : index
    %0 = vector.load %arg0[%c0, %c0_0] : memref<32x128xf32, #tpu.memory_space<vmem>>, vector<32x128xf32>
    %1 = arith.mulf %0, %0 : vector<32x128xf32>
    %cst = arith.constant dense<0.000000e+00> : vector<32xf32>
    %2 = vector.multi_reduction <add>, %1, %cst [1] : vector<32x128xf32> to vector<32xf32>
    %3 = vector.shape_cast %2 : vector<32xf32> to vector<32x1xf32>
    %4 = math.rsqrt %3 : vector<32x1xf32>
    %5 = vector.broadcast %4 : vector<32x1xf32> to vector<32x128xf32>
    %6 = arith.mulf %0, %5 : vector<32x128xf32>
    %7 = vector.extract_strided_slice %6 {offsets = [0, 0], sizes = [16, 128], strides = [1, 1]} : vector<32x128xf32> to vector<16x128xf32>
    %cst_1 = arith.constant dense<0.000000e+00> : vector<16x32xf32>
    %8 = tpu.matmul %7, %6, %cst_1 {dimension_numbers = #tpu.dot_dimension_numbers<[1], [1], [0], [0], [0, 0, 1, 0], [], []>} : vector<16x128xf32>, vector<32x128xf32>, vector<16x32xf32> -> vector<16x32xf32>
    %cst_2 = arith.constant 1.000000e+01 : f32
    %9 = vector.broadcast %cst_2 : f32 to vector<16x32xf32>
    %10 = arith.mulf %8, %9 : vector<16x32xf32>
    %11 = math.exp %10 : vector<16x32xf32>
    %12 = tpu.iota {dimensions = array<i32: 0>} : vector<16x32xi32>
    %13 = tpu.iota {dimensions = array<i32: 1>} : vector<16x32xi32>
    %c8_i32 = arith.constant 8 : i32
    %14 = vector.broadcast %c8_i32 : i32 to vector<16x32xi32>
    %15 = arith.cmpi sge, %12, %14 : vector<16x32xi32>
    %c8_i32_3 = arith.constant 8 : i32
    %16 = vector.broadcast %c8_i32_3 : i32 to vector<16x32xi32>
    %17 = arith.subi %12, %16 : vector<16x32xi32>
    %18 = arith.select %15, %17, %12 : vector<16x32xi1>, vector<16x32xi32>
    %19 = arith.cmpi eq, %13, %18 : vector<16x32xi32>
    %c8_i32_4 = arith.constant 8 : i32
    %20 = vector.broadcast %c8_i32_4 : i32 to vector<16x32xi32>
    %21 = arith.addi %18, %20 : vector<16x32xi32>
    %22 = arith.cmpi eq, %13, %21 : vector<16x32xi32>
    %23 = arith.ori %19, %22 : vector<16x32xi1>
    %c16_i32 = arith.constant 16 : i32
    %24 = vector.broadcast %c16_i32 : i32 to vector<16x32xi32>
    %25 = arith.addi %18, %24 : vector<16x32xi32>
    %26 = arith.cmpi eq, %13, %25 : vector<16x32xi32>
    %27 = arith.ori %23, %26 : vector<16x32xi1>
    %c24_i32 = arith.constant 24 : i32
    %28 = vector.broadcast %c24_i32 : i32 to vector<16x32xi32>
    %29 = arith.addi %18, %28 : vector<16x32xi32>
    %30 = arith.cmpi eq, %13, %29 : vector<16x32xi32>
    %31 = arith.ori %27, %30 : vector<16x32xi1>
    %32 = arith.cmpi eq, %13, %12 : vector<16x32xi32>
    %cst_5 = arith.constant dense<0.000000e+00> : vector<16xf32>
    %33 = vector.multi_reduction <add>, %11, %cst_5 [1] : vector<16x32xf32> to vector<16xf32>
    %34 = vector.shape_cast %33 : vector<16xf32> to vector<16x1xf32>
    %cst_6 = arith.constant 0.000000e+00 : f32
    %35 = vector.broadcast %cst_6 : f32 to vector<16x32xf32>
    %36 = arith.select %31, %11, %35 : vector<16x32xi1>, vector<16x32xf32>
    %cst_7 = arith.constant dense<0.000000e+00> : vector<16xf32>
    %37 = vector.multi_reduction <add>, %36, %cst_7 [1] : vector<16x32xf32> to vector<16xf32>
    %38 = vector.shape_cast %37 : vector<16xf32> to vector<16x1xf32>
    %cst_8 = arith.constant 0.000000e+00 : f32
    %39 = vector.broadcast %cst_8 : f32 to vector<16x32xf32>
    %40 = arith.select %32, %11, %39 : vector<16x32xi1>, vector<16x32xf32>
    %cst_9 = arith.constant dense<0.000000e+00> : vector<16xf32>
    %41 = vector.multi_reduction <add>, %40, %cst_9 [1] : vector<16x32xf32> to vector<16xf32>
    %42 = vector.shape_cast %41 : vector<16xf32> to vector<16x1xf32>
    %43 = arith.subf %38, %42 : vector<16x1xf32>
    %44 = arith.subf %34, %42 : vector<16x1xf32>
    %45 = math.log %44 : vector<16x1xf32>
    %46 = math.log %43 : vector<16x1xf32>
    %47 = arith.subf %45, %46 : vector<16x1xf32>
    %48 = vector.shape_cast %47 : vector<16x1xf32> to vector<1x16x1xf32>
    %cst_10 = arith.constant dense<0.000000e+00> : vector<1xf32>
    %49 = vector.multi_reduction <add>, %48, %cst_10 [1, 2] : vector<1x16x1xf32> to vector<1xf32>
    %50 = vector.shape_cast %49 : vector<1xf32> to vector<1x1x1xf32>
    %51 = vector.extract %50[0, 0, 0] : f32 from vector<1x1x1xf32>
    %cst_11 = arith.constant 1.600000e+01 : f32
    %52 = arith.divf %51, %cst_11 : f32
    %53 = vector.extract_strided_slice %6 {offsets = [0, 0], sizes = [8, 128], strides = [1, 1]} : vector<32x128xf32> to vector<8x128xf32>
    %54 = vector.extract_strided_slice %6 {offsets = [8, 0], sizes = [8, 128], strides = [1, 1]} : vector<32x128xf32> to vector<8x128xf32>
    %55 = vector.extract_strided_slice %6 {offsets = [16, 0], sizes = [8, 128], strides = [1, 1]} : vector<32x128xf32> to vector<8x128xf32>
    %56 = vector.extract_strided_slice %6 {offsets = [24, 0], sizes = [8, 128], strides = [1, 1]} : vector<32x128xf32> to vector<8x128xf32>
    %c0_12 = arith.constant 0 : index
    %c0_13 = arith.constant 0 : index
    %57 = vector.load %arg1[%c0_12, %c0_13] : memref<8x2xf32, #tpu.memory_space<vmem>>, vector<8x2xf32>
    %58 = vector.extract_strided_slice %57 {offsets = [0, 0], sizes = [8, 1], strides = [1, 1]} : vector<8x2xf32> to vector<8x1xf32>
    %59 = vector.extract_strided_slice %57 {offsets = [0, 1], sizes = [8, 1], strides = [1, 1]} : vector<8x2xf32> to vector<8x1xf32>
    %60 = vector.broadcast %58 : vector<8x1xf32> to vector<8x128xf32>
    %61 = arith.mulf %60, %53 : vector<8x128xf32>
    %cst_14 = arith.constant 1.000000e+00 : f32
    %62 = vector.broadcast %cst_14 : f32 to vector<8x1xf32>
    %63 = arith.subf %62, %58 : vector<8x1xf32>
    %64 = vector.broadcast %63 : vector<8x1xf32> to vector<8x128xf32>
    %65 = arith.mulf %64, %54 : vector<8x128xf32>
    %66 = arith.addf %61, %65 : vector<8x128xf32>
    %67 = vector.broadcast %59 : vector<8x1xf32> to vector<8x128xf32>
    %68 = arith.mulf %67, %54 : vector<8x128xf32>
    %cst_15 = arith.constant 1.000000e+00 : f32
    %69 = vector.broadcast %cst_15 : f32 to vector<8x1xf32>
    %70 = arith.subf %69, %59 : vector<8x1xf32>
    %71 = vector.broadcast %70 : vector<8x1xf32> to vector<8x128xf32>
    %72 = arith.mulf %71, %53 : vector<8x128xf32>
    %73 = arith.addf %68, %72 : vector<8x128xf32>
    %74 = arith.subf %55, %66 : vector<8x128xf32>
    %75 = arith.mulf %74, %74 : vector<8x128xf32>
    %cst_16 = arith.constant dense<0.000000e+00> : vector<8xf32>
    %76 = vector.multi_reduction <add>, %75, %cst_16 [1] : vector<8x128xf32> to vector<8xf32>
    %77 = vector.shape_cast %76 : vector<8xf32> to vector<8x1xf32>
    %78 = math.sqrt %77 : vector<8x1xf32>
    %79 = arith.subf %56, %73 : vector<8x128xf32>
    %80 = arith.mulf %79, %79 : vector<8x128xf32>
    %cst_17 = arith.constant dense<0.000000e+00> : vector<8xf32>
    %81 = vector.multi_reduction <add>, %80, %cst_17 [1] : vector<8x128xf32> to vector<8xf32>
    %82 = vector.shape_cast %81 : vector<8xf32> to vector<8x1xf32>
    %83 = math.sqrt %82 : vector<8x1xf32>
    %84 = arith.addf %78, %83 : vector<8x1xf32>
    %85 = vector.shape_cast %84 : vector<8x1xf32> to vector<1x8x1xf32>
    %cst_18 = arith.constant dense<0.000000e+00> : vector<1xf32>
    %86 = vector.multi_reduction <add>, %85, %cst_18 [1, 2] : vector<1x8x1xf32> to vector<1xf32>
    %87 = vector.shape_cast %86 : vector<1xf32> to vector<1x1x1xf32>
    %88 = vector.extract %87[0, 0, 0] : f32 from vector<1x1x1xf32>
    %cst_19 = arith.constant 8.000000e+00 : f32
    %89 = arith.divf %88, %cst_19 : f32
    %cst_20 = arith.constant 5.000000e-01 : f32
    %90 = arith.mulf %cst_20, %89 : f32
    %91 = arith.addf %52, %90 : f32
    %c0_21 = arith.constant 0 : index
    %92 = memref.load %arg2[%c0_21] : memref<3xf32, #tpu.memory_space<smem>>
    memref.store %52, %arg2[%c0_21] : memref<3xf32, #tpu.memory_space<smem>>
    %c1 = arith.constant 1 : index
    %93 = memref.load %arg2[%c1] : memref<3xf32, #tpu.memory_space<smem>>
    memref.store %89, %arg2[%c1] : memref<3xf32, #tpu.memory_space<smem>>
    %c2 = arith.constant 2 : index
    %94 = memref.load %arg2[%c2] : memref<3xf32, #tpu.memory_space<smem>>
    memref.store %91, %arg2[%c2] : memref<3xf32, #tpu.memory_space<smem>>
    return
  }
}

</mosaic_0001>

<bundles_post_ra>
// kernel: _loss_vector.1
= control target key start
LH: loop header
LB: loop body
LE: loop exit
PB: predicated region body
PF: predicated region fallthrough
CT: control target
= control target key end

     0   :  { %v356_v4 = vmov 1   ;;  %s422_s0 = inlined_call_operand.vmem [shape: f32[32,128], index: 0, kind: input, shape index: {}]   ;;  %s423_s1 = inlined_call_operand.vmem [shape: f32[8,2], index: 1, kind: input, shape index: {}]   ;;  %s424_s2 = inlined_call_operand.hbm [shape: f32[3], index: 2, kind: output, shape index: {}]  }
   0x1   :  { %v15_v0 = vld [vmem:[%s422_s0 + $0x18] sm:$0xff]  ;;  %v382_v1 = vld [vmem:[%s422_s0 + $0x8] sm:$0xff]  ;;  %312 = vset.pattern.permute.xlu0 %v356_v4  ;;  %313 = vset.pattern.permute.xlu1 %v356_v4 }
   0x2   :  { %v19_v2 = vmul.f32 %v15_v0, %v15_v0  ;;  %v17_v3 = vmul.f32 %v382_v1, %v382_v1 }
   0x3   :  { %7 = vsyncpa [#allocation3], 0  ;;  %v389_v5 = vld [vmem:[%s422_s0 + $0x10] sm:$0xff]  ;;  %v394_v6 = vld [vmem:[%s422_s0] sm:$0xff]  ;;  %v357_v8 = vmov 0   ;;  %vm133_vm14 = vcmask 261120  }
   0x4   :  { %26 = vadd.xlane.f32.xlu0 %v19_v2  ;;  %22 = vadd.xlane.f32.xlu1 %v17_v3  ;;  %v192_v7 = vld [vmem:[%s423_s1] sm:$0xff]  ;;  %v18_v9 = vmul.f32 %v389_v5, %v389_v5  ;;  %v16_v10 = vmul.f32 %v394_v6, %v394_v6  ;;  %s283_s24 = sshll.u32 %s424_s2, 4  ;;  %s360_s28 = smov [#allocation2]   ;;  %s284_s24 = int_to_ptr.hbm [resolvable:$true] %s283_s24 }
   0x5   :  { %311 = vset.pattern.permute.xlu2 %v357_v8  ;;  %v199_v11 = vsub.f32 1.0, %v192_v7 }
   0x6   :  { %195 = vperm.xlu2 %311, %v192_v7  }
   0xc   :  { %24 = vadd.xlane.f32.xlu0 %v18_v9  ;;  %20 = vadd.xlane.f32.xlu1 %v16_v10 }
   0xe   :  { %202 = vperm.xlu2 %311, %v199_v11  }
  0x20   :  { %208 = vperm.xlu0 %312, %v192_v7  }
  0x25   :  { %213 = vperm.xlu1 %313, %v199_v11  }
  0x60   :  { %v196_v31 = vpop.permute.xlu2 %195 }
  0x68   :  { %v203_v47 = vpop.permute.xlu2 %202 }
  0x77   :  { %v27_v12 = vpop.xlane.xlu0 %26  ;;  %v23_v13 = vpop.xlane.xlu1 %22 }
  0x78   :  { %314 = vrsqrt.f32 %v27_v12  ;;  %vm64_vm1 = vweird.f32 %v27_v12  ;;  %vm44_vm3 = vweird.f32 %v23_v13 }
  0x79   :  { %316 = vrsqrt.f32 %v23_v13 }
  0x7e   :  { %v315_v14 = vpop.eup %314 }
  0x7f   :  { %v317_v15 = vpop.eup %316  ;;  %v59_v16 = vmul.f32 %v315_v14, %v27_v12  ;;  %v25_v17 = vpop.xlane.xlu0 %24  ;;  %vm65_vm0 = vweird.f32 %v315_v14 }
  0x80   :  { %v21_v18 = vpop.xlane.xlu1 %20  ;;  %v39_v19 = vmul.f32 %v317_v15, %v23_v13  ;;  %318 = vrsqrt.f32 %v25_v17  ;;  %vm66_vm2 = vmor %vm64_vm1, %vm65_vm0  ;;  %vm45_vm4 = vweird.f32 %v317_v15  ;;  %vm54_vm9 = vweird.f32 %v25_v17 }
  0x81   :  { %v60_v20 = vmul.f32 %v315_v14, %v59_v16  ;;  %320 = vrsqrt.f32 %v21_v18  ;;  %vm46_vm5 = vmor %vm44_vm3, %vm45_vm4  ;;  %vm34_vm7 = vweird.f32 %v21_v18 }
  0x82   :  { %v40_v21 = vmul.f32 %v317_v15, %v39_v19 }
  0x83   :  { %v61_v22 = vmul.f32 0.5, %v60_v20 }
  0x84   :  { %v41_v23 = vmul.f32 0.5, %v40_v21 }
  0x85   :  { %v62_v24 = vsub.f32 1.5, %v61_v22 }
  0x86   :  { %v319_v25 = vpop.eup %318  ;;  %v42_v26 = vsub.f32 1.5, %v41_v23 }
  0x87   :  { %v321_v27 = vpop.eup %320  ;;  %v63_v28 = vmul.f32 %v315_v14, %v62_v24  ;;  %v49_v29 = vmul.f32 %v319_v25, %v25_v17  ;;  %vm55_vm6 = vweird.f32 %v319_v25 }
  0x88   :  { %v29_v30 = vmul.f32 %v321_v27, %v21_v18  ;;  %v43_v34 = vmul.f32 %v317_v15, %v42_v26  ;;  %vm35_vm8 = vweird.f32 %v321_v27  ;;  %vm56_vm10 = vmor %vm54_vm9, %vm55_vm6 }
  0x89   :  { %v50_v32 = vmul.f32 %v319_v25, %v49_v29  ;;  %v67_v33 = vsel %vm66_vm2, %v315_v14, %v63_v28  ;;  %vm36_vm11 = vmor %vm34_vm7, %vm35_vm8  ;;  %vm170_vm8 = vcmask 7168  }
  0x8a   :  { %v30_v35 = vmul.f32 %v321_v27, %v29_v30  ;;  %v71_v36 = vmul.f32 %v67_v33, %v15_v0  ;;  %v47_v40 = vsel %vm46_vm5, %v317_v15, %v43_v34  ;;  %v101_v0 = vlaneseq }
  0x8b   :  { %v51_v37 = vmul.f32 0.5, %v50_v32  ;;  %v69_v44 = vmul.f32 %v47_v40, %v382_v1 }
  0x8c   :  { %v31_v38 = vmul.f32 0.5, %v30_v35  ;;  %84 = vmatpush.xpose.msra.mxu0 %v71_v36  ;;  %294 = vmatpush.xpose.msra.mxu1 %v71_v36  ;;  %v102_v4 = vshrl.u32 %v101_v0, 7  ;;  %v105_v14 = vand.u32 127, %v101_v0 }
  0x8d   :  { %v52_v39 = vsub.f32 1.5, %v51_v37  ;;  %v205_v51 = vmul.f32 %v203_v47, %v69_v44 }
  0x8e   :  { %v32_v41 = vsub.f32 1.5, %v31_v38  ;;  %v103_v13 = vadd.s32 8, %v102_v4  ;;  %v119_v19 = vadd.s32 16, %v102_v4  ;;  %vm111_vm12 = vcmp.eq.s32.totalorder %v105_v14, %v102_v4 }
  0x8f   :  { %v53_v42 = vmul.f32 %v319_v25, %v52_v39  ;;  %v125_v23 = vadd.s32 24, %v102_v4 }
  0x90   :  { %v33_v43 = vmul.f32 %v321_v27, %v32_v41  ;;  %vm115_vm13 = vcmp.eq.s32.totalorder %v105_v14, %v103_v13  ;;  %vm121_vm0 = vcmp.eq.s32.totalorder %v105_v14, %v119_v19 }
  0x91   :  { %v57_v45 = vsel %vm56_vm10, %v319_v25, %v53_v42  ;;  %vm117_vm15 = vmor %vm111_vm12, %vm115_vm13  ;;  %vm127_vm3 = vcmp.eq.s32.totalorder %v105_v14, %v125_v23 }
  0x92   :  { %v37_v46 = vsel %vm36_vm11, %v321_v27, %v33_v43  ;;  %v70_v48 = vmul.f32 %v57_v45, %v389_v5  ;;  %v209_v52 = vpop.permute.xlu0 %208  ;;  %vm123_vm2 = vmor %vm117_vm15, %vm121_vm0 }
  0x93   :  { %v68_v49 = vmul.f32 %v37_v46, %v394_v6  ;;  %v211_v55 = vmul.f32 %v209_v52, %v69_v44  ;;  %vm129_vm6 = vmor %vm123_vm2, %vm127_vm3 }
  0x94   :  { %85 = vmatpush.xpose.msra.mxu0 %v70_v48  ;;  %295 = vmatpush.xpose.msra.mxu1 %v70_v48 }
  0x95   :  { %v198_v50 = vmul.f32 %v196_v31, %v68_v49 }
  0x97   :  { %v206_v53 = vadd.f32 %v205_v51, %v198_v50  ;;  %v214_v54 = vpop.permute.xlu1 %213 }
  0x98   :  { %v216_v56 = vmul.f32 %v214_v54, %v68_v49  ;;  %86 = vmatpush.xpose.msra.mxu0 %v69_v44  ;;  %296 = vmatpush.xpose.msra.mxu1 %v69_v44 }
  0x99   :  { %v218_v57 = vsub.f32 %v70_v48, %v206_v53 }
  0x9a   :  { %v217_v58 = vadd.f32 %v216_v56, %v211_v55 }
  0x9b   :  { %v219_v59 = vmul.f32 %v218_v57, %v218_v57 }
  0x9c   :  { %87 = vmatpush.xpose.msra.mxu0 %v68_v49  ;;  %297 = vmatpush.xpose.msra.mxu1 %v68_v49  ;;  %v234_v60 = vsub.f32 %v71_v36, %v217_v58 }
  0x9d   :  { %220 = vadd.xlane.f32.xlu2 %v219_v59 }
  0x9e   :  { %v235_v61 = vmul.f32 %v234_v60, %v234_v60 }
  0x9f   :  { %88 = vmatmul.f32.vlgmr.msra.gmra.mxu0 %v68_v49  ;;  %91 = vmatmul.f32.vlgmr.msra.gmra.mxu1 %v69_v44 }
  0xa0   :  { %236 = vadd.xlane.f32.xlu1 %v235_v61 }
 0x110   :  { %v221_v62 = vpop.xlane.xlu2 %220 }
 0x111   :  { %322 = vrsqrt.f32 %v221_v62  ;;  %vm229_vm4 = vcmp.eq.f32.partialorder %v221_v62, inf  ;;  %v232_v35 = vand.u32 2147483648, %v221_v62  ;;  %vm231_vm7 = vcmp.eq.f32.partialorder %v221_v62, 0.0 }
 0x113   :  { %v237_v63 = vpop.xlane.xlu1 %236 }
 0x114   :  { %324 = vrsqrt.f32 %v237_v63  ;;  %vm245_vm1 = vcmp.eq.f32.partialorder %v237_v63, inf  ;;  %v248_v32 = vand.u32 2147483648, %v237_v63  ;;  %vm247_vm5 = vcmp.eq.f32.partialorder %v237_v63, 0.0 }
 0x117   :  { %v323_v1 = vpop.eup %322 }
 0x118   :  { %v223_v2 = vmul.f32 %v323_v1, %v221_v62 }
 0x11a   :  { %v325_v3 = vpop.eup %324  ;;  %v224_v5 = vmul.f32 %v323_v1, %v223_v2 }
 0x11b   :  { %v239_v6 = vmul.f32 %v325_v3, %v237_v63 }
 0x11c   :  { %v89_v7 = vpop.f32.mrf.mxu0  ;;  %v92_v8 = vpop.f32.mrf.mxu1  ;;  %v225_v9 = vmul.f32 0.5, %v224_v5  ;;  %v358_v5 = vmov 16.0  }
 0x11d   :  { %v95_v10 = vmul.f32 10.0, %v89_v7  ;;  %v96_v11 = vmul.f32 10.0, %v92_v8  ;;  %v240_v12 = vmul.f32 %v325_v3, %v239_v6  ;;  %v359_v6 = vmov 8.0  }
 0x11e   :  { %v226_v15 = vsub.f32 1.5, %v225_v9 }
 0x11f   :  { %v97_v16 = vmul.f32 1.442695, %v95_v10  ;;  %v99_v17 = vmul.f32 1.442695, %v96_v11  ;;  %v241_v18 = vmul.f32 0.5, %v240_v12 }
 0x120   :  { %v227_v21 = vmul.f32 %v323_v1, %v226_v15 }
 0x121   :  { %326 = vpow2.f32 %v97_v16  ;;  %v242_v20 = vsub.f32 1.5, %v241_v18 }
 0x122   :  { %328 = vpow2.f32 %v99_v17  ;;  %v228_v25 = vmul.f32 %v227_v21, %v221_v62 }
 0x123   :  { %v243_v22 = vmul.f32 %v325_v3, %v242_v20 }
 0x124   :  { %v230_v34 = vsel %vm229_vm4, %v221_v62, %v228_v25 }
 0x125   :  { %v244_v24 = vmul.f32 %v243_v22, %v237_v63  ;;  %v233_v37 = vsel %vm231_vm7, %v232_v35, %v230_v34 }
 0x127   :  { %v327_v26 = vpop.eup %326  ;;  %v246_v29 = vsel %vm245_vm1, %v237_v63, %v244_v24 }
 0x128   :  { %v329_v27 = vpop.eup %328  ;;  %v134_v28 = vsel %vm133_vm14, %v327_v26, 0.0  ;;  %v249_v36 = vsel %vm247_vm5, %v248_v32, %v246_v29  ;;  %v140_v38 = vsel %vm129_vm6, %v327_v26, 0.0  ;;  %v148_v44 = vsel %vm111_vm12, %v327_v26, 0.0 }
 0x129   :  { %v137_v30 = vsel %vm133_vm14, %v329_v27, 0.0  ;;  %135 = vadd.xlane.f32.xlu0 %v134_v28  ;;  %v149_v31 = vsel %vm115_vm13, %v329_v27, 0.0  ;;  %v250_v39 = vadd.f32 %v249_v36, %v233_v37  ;;  %v142_v40 = vsel %vm133_vm14, %v140_v38, 0.0 }
 0x12a   :  { %138 = vadd.xlane.f32.xlu2 %v137_v30  ;;  %v153_v33 = vsel %vm133_vm14, %v149_v31, 0.0  ;;  %v141_v42 = vsel %vm129_vm6, %v329_v27, 0.0  ;;  %v150_v45 = vsel %vm133_vm14, %v148_v44, 0.0 }
 0x12b   :  { %154 = vadd.xlane.f32.xlu1 %v153_v33  ;;  %v251_v41 = vsel %vm170_vm8, %v250_v39, 0.0  ;;  %v145_v43 = vsel %vm133_vm14, %v141_v42, 0.0 }
 0x132   :  { %143 = vadd.xlane.f32.xlu2 %v142_v40 }
 0x133   :  { %252 = vadd.xlane.f32.xlu1 %v251_v41 }
 0x13a   :  { %146 = vadd.xlane.f32.xlu2 %v145_v43 }
 0x142   :  { %151 = vadd.xlane.f32.xlu2 %v150_v45 }
 0x19c   :  { %v136_v52 = vpop.xlane.xlu0 %135 }
 0x19d   :  { %v139_v46 = vpop.xlane.xlu2 %138 }
 0x19e   :  { %v155_v49 = vpop.xlane.xlu1 %154 }
 0x19f   :  { %v159_v51 = vsub.f32 %v139_v46, %v155_v49 }
 0x1a5   :  { %v144_v47 = vpop.xlane.xlu2 %143 }
 0x1a6   :  { %v253_v7 = vpop.xlane.xlu1 %252 }
 0x1a7   :  { %v254_v9 = vrot.slane %v253_v7, 4 }
 0x1a9   :  { %v255_v12 = vadd.f32 %v254_v9, %v253_v7 }
 0x1ab   :  { %v256_v16 = vrot.slane %v255_v12, 2 }
 0x1ad   :  { %v147_v48 = vpop.xlane.xlu2 %146  ;;  %v257_v21 = vadd.f32 %v256_v16, %v255_v12 }
 0x1ae   :  { %v157_v50 = vsub.f32 %v147_v48, %v155_v49 }
 0x1af   :  { %v258_v27 = vrot.slane %v257_v21, 1 }
 0x1b0   :  { %330 = vlog2.f32 %v157_v50 }
 0x1b1   :  { %332 = vlog2.f32 %v159_v51  ;;  %v259_v31 = vadd.f32 %v258_v27, %v257_v21 }
 0x1b5   :  { %v152_v53 = vpop.xlane.xlu2 %151 }
 0x1b6   :  { %v156_v54 = vsub.f32 %v144_v47, %v152_v53  ;;  %v158_v55 = vsub.f32 %v136_v52, %v152_v53  ;;  %v331_v56 = vpop.eup %330 }
 0x1b7   :  { %v333_v57 = vpop.eup %332  ;;  %v167_v58 = vmul.f32 0.6931472, %v331_v56 }
 0x1b8   :  { %334 = vlog2.f32 %v158_v55  ;;  %v163_v60 = vmul.f32 0.6931472, %v333_v57 }
 0x1b9   :  { %336 = vlog2.f32 %v156_v54 }
 0x1ba   :  { %v169_v0 = vsub.f32 %v163_v60, %v167_v58  ;;  %338 = vrcp.f32 %v358_v5 }
 0x1bb   :  { %340 = vrcp.f32 %v359_v6 }
 0x1bc   :  { %v172_v3 = vsel %vm170_vm8, %v169_v0, 0.0 }
 0x1be   :  { %v335_v59 = vpop.eup %334 }
 0x1bf   :  { %v337_v61 = vpop.eup %336  ;;  %v161_v62 = vmul.f32 0.6931472, %v335_v59 }
 0x1c0   :  { %v165_v63 = vmul.f32 0.6931472, %v337_v61  ;;  %v339_v8 = vpop.eup %338 }
 0x1c1   :  { %v341_v10 = vpop.eup %340  ;;  %v184_v11 = vmul.f32 16.0, %v339_v8  ;;  %vm188_vm9 = vweird.f32 %v339_v8 }
 0x1c2   :  { %v168_v1 = vsub.f32 %v161_v62, %v165_v63  ;;  %v262_v13 = vmul.f32 8.0, %v341_v10  ;;  %vm266_vm10 = vweird.f32 %v341_v10 }
 0x1c3   :  { %v185_v14 = vsub.f32 1.0, %v184_v11 }
 0x1c4   :  { %v171_v2 = vsel %vm170_vm8, %v168_v1, 0.0  ;;  %v263_v18 = vsub.f32 1.0, %v262_v13 }
 0x1c5   :  { %v173_v4 = vadd.f32 %v172_v3, %v171_v2  ;;  %v186_v20 = vmul.f32 %v339_v8, %v185_v14 }
 0x1c6   :  { %v264_v23 = vmul.f32 %v341_v10, %v263_v18 }
 0x1c7   :  { %174 = vadd.xlane.f32.xlu2 %v173_v4  ;;  %v187_v25 = vadd.f32 %v339_v8, %v186_v20 }
 0x1c8   :  { %v265_v28 = vadd.f32 %v341_v10, %v264_v23 }
 0x1c9   :  { %v189_v30 = vsel %vm188_vm9, %v339_v8, %v187_v25 }
 0x1ca   :  { %v267_v32 = vsel %vm266_vm10, %v341_v10, %v265_v28 }
 0x23a   :  { %v175_v15 = vpop.xlane.xlu2 %174 }
 0x23b   :  { %v176_v17 = vrot.slane %v175_v15, 4 }
 0x23d   :  { %v177_v19 = vadd.f32 %v176_v17, %v175_v15 }
 0x23f   :  { %v178_v22 = vrot.slane %v177_v19, 2 }
 0x241   :  { %v179_v24 = vadd.f32 %v178_v22, %v177_v19 }
 0x243   :  { %v180_v26 = vrot.slane %v179_v24, 1 }
 0x245   :  { %v181_v29 = vadd.f32 %v180_v26, %v179_v24 }
 0x247   :  { %298 = vpush %v181_v29 }
 0x248   :  { %300 = vpush %v189_v30 }
 0x249   :  { %302 = vpush %v259_v31 }
 0x24a   :  { %304 = vpush %v267_v32 }
 0x278   :  { %s299_s0 = spop %298 }
 0x279   :  { %s301_s1 = spop %300 }
 0x27a   :  { %s191_s19 = smul.f32 %s301_s1, %s299_s0  ;;  %s303_s20 = spop %302 }
 0x27b   :  { %s305_s21 = spop %304 }
 0x27c   :  { %273 = sst [smem:[#allocation2]] %s191_s19  ;;  %s269_s25 = smul.f32 %s305_s21, %s303_s20 }
 0x27e   :  { %s270_s26 = smul.f32 0.5, %s269_s25  ;;  %275 = sst [smem:[#allocation2 + $0x1]] %s269_s25 }
 0x280   :  { %s271_s27 = sadd.f32 %s270_s26, %s191_s19 }
 0x282   :  { %277 = sst [smem:[#allocation2 + $0x2]] %s271_s27 }
 0x283   :  { %286 = dma.smem_to_hbm %s360_s28, 16, %s284_s24, [#allocation3]  }
 0x284   :  { %354 = dma.done.wait [#allocation3], 16  }
 0x285   :  { %355 = vsyncadd [#allocation3], 4294967280 }
 0x286   :  { %291 = sfence }
 0x287   :  { %292 = vsyncpa [#allocation3], 1 }

</bundles_post_ra>
